<compile_context>
chip_gen: v7x
topology: tpu7x:2x2x1
jax: 0.10.0
libtpu: 0.0.40
codegen_flags: <defaults>
</compile_context>

<pallas_src>
import functools

import jax
import jax.numpy as jnp
from jax.experimental import pallas as pl
from jax.experimental.pallas import tpu as pltpu


def _fused_pixelwise_kernel(alpha_ref, x_ref, *rest, n_layers):
    # alpha_ref: (n_layers,) f32 in SMEM  (PReLU scalar per layer)
    # x_ref:     (1, C0, T)  input pixel tile, channels on sublanes, pixels on lanes
    # rest:      w0 (C1, C0), b0 (C1, 1), w1 (C2, C1), b1 (C2, 1), ..., out_ref
    out_ref = rest[-1]
    wb_refs = rest[:-1]

    h = x_ref[0].astype(jnp.float32)  # (C0, T)
    for li in range(n_layers):
        w = wb_refs[2 * li][...]          # (Cout, Cin), constant VMEM block
        b = wb_refs[2 * li + 1][...]      # (Cout, 1) -> broadcasts over lanes
        y = jnp.dot(w, h, preferred_element_type=jnp.float32) + b
        alpha = alpha_ref[li]             # scalar read from SMEM
        h = jnp.where(y > 0, y, alpha * y)  # PReLU (single shared alpha)
    out_ref[0] = h.astype(out_ref.dtype)


def pixelwise_linear_forward(x_nchw, params, *, tile_pixels=4096):
    """Full PixelwiseLinear forward, fused into one Pallas kernel.

    x_nchw: (N, C0, H, W) float32
    params: list of (w (Cout, Cin), b (Cout,), alpha scalar) per layer
            (w matches the PyTorch Conv2d 1x1 weight with spatial dims squeezed).
    Returns (N, C_last, H, W).
    """
    N, C0, H, W = x_nchw.shape
    HW = H * W
    n_layers = len(params)
    assert n_layers >= 1
    assert params[0][0].shape[1] == C0
    c_last = params[-1][0].shape[0]

    # NCHW is already channels-first: just merge the spatial dims. No transpose.
    x = x_nchw.reshape(N, C0, HW)

    # Pixel tile: multiple of 128 lanes, no larger than needed to cover HW.
    tile_hw = ((min(tile_pixels, HW) + 127) // 128) * 128
    grid = (N, pl.cdiv(HW, tile_hw))

    # Pack per-layer PReLU alphas into one SMEM scalar table.
    alphas = jnp.stack(
        [jnp.asarray(a, jnp.float32).reshape(()) for (_, _, a) in params]
    )

    in_specs = [
        pl.BlockSpec(memory_space=pltpu.MemorySpace.SMEM),          # alphas
        pl.BlockSpec((1, C0, tile_hw), lambda n, t: (n, 0, t)),     # x tile
    ]
    wb_args = []
    for (w, b, _) in params:
        cout, cin = w.shape
        wb_args.append(w.astype(jnp.float32))
        wb_args.append(b.reshape(cout, 1).astype(jnp.float32))
        # Full-array blocks with a constant index_map: fetched once, reused.
        in_specs.append(pl.BlockSpec((cout, cin), lambda n, t: (0, 0)))
        in_specs.append(pl.BlockSpec((cout, 1), lambda n, t: (0, 0)))

    out_spec = pl.BlockSpec((1, c_last, tile_hw), lambda n, t: (n, 0, t))

    kernel = functools.partial(_fused_pixelwise_kernel, n_layers=n_layers)

    out = pl.pallas_call(
        kernel,
        out_shape=jax.ShapeDtypeStruct((N, c_last, HW), x_nchw.dtype),
        grid_spec=pltpu.PrefetchScalarGridSpec(
            num_scalar_prefetch=0,
            grid=grid,
            in_specs=in_specs,
            out_specs=out_spec,
        ),
        compiler_params=pltpu.CompilerParams(
            dimension_semantics=("parallel", "parallel"),
        ),
    )(alphas, x, *wb_args)

    return out.reshape(N, c_last, H, W)


def init_params(key, fin, fout):
    """Deterministic synthetic init mirroring the module's parameter shapes.

    Conv2d(fin[i], fout[i], kernel_size=1, bias=True) -> weight (fout, fin)
    (1x1 spatial dims squeezed); PReLU() -> single alpha = 0.25.
    """
    assert len(fin) == len(fout)
    params = []
    for i in range(len(fin)):
        key, kw, kb = jax.random.split(key, 3)
        scale = 1.0 / jnp.sqrt(jnp.float32(fin[i]))
        w = jax.random.uniform(kw, (fout[i], fin[i]), jnp.float32,
                               minval=-scale, maxval=scale)
        b = jax.random.uniform(kb, (fout[i],), jnp.float32,
                               minval=-scale, maxval=scale)
        alpha = jnp.float32(0.25)  # nn.PReLU() default init
        params.append((w, b, alpha))
    return params


def reference_forward(x_nchw, params):
    """Pure-JAX reference (same math, no Pallas) for sanity checking."""
    x = x_nchw
    for (w, b, alpha) in params:
        y = jnp.einsum("oc,nchw->nohw", w, x) + b.reshape(1, -1, 1, 1)
        x = jnp.where(y > 0, y, alpha * y)
    return x


if __name__ == "__main__":
    key = jax.random.PRNGKey(0)
    kx, kp = jax.random.split(key)

    # Small shapes consistent with the module: fin=[4, 32], fout=[32, 8]
    fin = [4, 32]
    fout = [32, 8]
    N, H, W = 2, 16, 16
    x = jax.random.normal(kx, (N, fin[0], H, W), jnp.float32)

    params = init_params(kp, fin, fout)

    out = pixelwise_linear_forward(x, params)
    out = jax.block_until_ready(out)

    ref = reference_forward(x, params)
    assert out.shape == (N, fout[-1], H, W), out.shape
    assert jnp.allclose(out, ref, atol=1e-5, rtol=1e-5), "mismatch vs reference"

    print("KERNEL_OK")
</pallas_src>

<mosaic_0001>
module attributes {stable_mosaic.version = 11 : i64} {
  func.func @_fused_pixelwise_kernel(%arg0: i32, %arg1: i32, %arg2: memref<2xf32, #tpu.memory_space<smem>>, %arg3: memref<1x4x256xf32, #tpu.memory_space<vmem>>, %arg4: memref<32x4xf32, #tpu.memory_space<vmem>>, %arg5: memref<32x1xf32, #tpu.memory_space<vmem>>, %arg6: memref<8x32xf32, #tpu.memory_space<vmem>>, %arg7: memref<8x1xf32, #tpu.memory_space<vmem>>, %arg8: memref<1x8x256xf32, #tpu.memory_space<vmem>>) attributes {dimension_semantics = [#tpu.dimension_semantics<parallel>, #tpu.dimension_semantics<parallel>], iteration_bounds = array<i64: 2, 1>, scalar_prefetch = 0 : i64, scratch_operands = 0 : i64, tpu.core_type = #tpu.core_type<tc>, window_params = [{transform_indices = @transform_0, window_bounds = array<i64: 2>}, {transform_indices = @transform_1, window_bounds = array<i64: 1, 4, 256>}, {pipeline_mode = #tpu.pipeline_mode<synchronous>, transform_indices = @transform_2, window_bounds = array<i64: 32, 4>}, {pipeline_mode = #tpu.pipeline_mode<synchronous>, transform_indices = @transform_3, window_bounds = array<i64: 32, 1>}, {pipeline_mode = #tpu.pipeline_mode<synchronous>, transform_indices = @transform_4, window_bounds = array<i64: 8, 32>}, {pipeline_mode = #tpu.pipeline_mode<synchronous>, transform_indices = @transform_5, window_bounds = array<i64: 8, 1>}, {transform_indices = @transform_6, window_bounds = array<i64: 1, 8, 256>}]} {
    %c0 = arith.constant 0 : index
    %c0_0 = arith.constant 0 : index
    %c0_1 = arith.constant 0 : index
    %0 = vector.load %arg3[%c0, %c0_0, %c0_1] : memref<1x4x256xf32, #tpu.memory_space<vmem>>, vector<1x4x256xf32>
    %1 = vector.shape_cast %0 : vector<1x4x256xf32> to vector<4x256xf32>
    %c0_2 = arith.constant 0 : index
    %c0_3 = arith.constant 0 : index
    %2 = vector.load %arg4[%c0_2, %c0_3] : memref<32x4xf32, #tpu.memory_space<vmem>>, vector<32x4xf32>
    %c0_4 = arith.constant 0 : index
    %c0_5 = arith.constant 0 : index
    %3 = vector.load %arg5[%c0_4, %c0_5] : memref<32x1xf32, #tpu.memory_space<vmem>>, vector<32x1xf32>
    %cst = arith.constant dense<0.000000e+00> : vector<32x256xf32>
    %4 = tpu.matmul %2, %1, %cst {dimension_numbers = #tpu.dot_dimension_numbers<[1], [0], [0], [1], [0, 0, 1, 1], [], []>} : vector<32x4xf32>, vector<4x256xf32>, vector<32x256xf32> -> vector<32x256xf32>
    %5 = vector.broadcast %3 : vector<32x1xf32> to vector<32x256xf32>
    %6 = arith.addf %4, %5 : vector<32x256xf32>
    %c0_6 = arith.constant 0 : index
    %7 = memref.load %arg2[%c0_6] : memref<2xf32, #tpu.memory_space<smem>>
    %cst_7 = arith.constant 0.000000e+00 : f32
    %8 = vector.broadcast %cst_7 : f32 to vector<32x256xf32>
    %9 = arith.cmpf ogt, %6, %8 : vector<32x256xf32>
    %10 = vector.broadcast %7 : f32 to vector<32x256xf32>
    %11 = arith.mulf %10, %6 : vector<32x256xf32>
    %12 = arith.select %9, %6, %11 : vector<32x256xi1>, vector<32x256xf32>
    %c0_8 = arith.constant 0 : index
    %c0_9 = arith.constant 0 : index
    %13 = vector.load %arg6[%c0_8, %c0_9] : memref<8x32xf32, #tpu.memory_space<vmem>>, vector<8x32xf32>
    %c0_10 = arith.constant 0 : index
    %c0_11 = arith.constant 0 : index
    %14 = vector.load %arg7[%c0_10, %c0_11] : memref<8x1xf32, #tpu.memory_space<vmem>>, vector<8x1xf32>
    %cst_12 = arith.constant dense<0.000000e+00> : vector<8x256xf32>
    %15 = tpu.matmul %13, %12, %cst_12 {dimension_numbers = #tpu.dot_dimension_numbers<[1], [0], [0], [1], [0, 0, 1, 1], [], []>} : vector<8x32xf32>, vector<32x256xf32>, vector<8x256xf32> -> vector<8x256xf32>
    %16 = vector.broadcast %14 : vector<8x1xf32> to vector<8x256xf32>
    %17 = arith.addf %15, %16 : vector<8x256xf32>
    %c1 = arith.constant 1 : index
    %18 = memref.load %arg2[%c1] : memref<2xf32, #tpu.memory_space<smem>>
    %cst_13 = arith.constant 0.000000e+00 : f32
    %19 = vector.broadcast %cst_13 : f32 to vector<8x256xf32>
    %20 = arith.cmpf ogt, %17, %19 : vector<8x256xf32>
    %21 = vector.broadcast %18 : f32 to vector<8x256xf32>
    %22 = arith.mulf %21, %17 : vector<8x256xf32>
    %23 = arith.select %20, %17, %22 : vector<8x256xi1>, vector<8x256xf32>
    %c0_14 = arith.constant 0 : index
    %c0_15 = arith.constant 0 : index
    %c0_16 = arith.constant 0 : index
    %24 = vector.load %arg8[%c0_14, %c0_15, %c0_16] : memref<1x8x256xf32, #tpu.memory_space<vmem>>, vector<1x8x256xf32>
    %25 = vector.shape_cast %24 : vector<1x8x256xf32> to vector<8x256xf32>
    %26 = vector.shape_cast %23 : vector<8x256xf32> to vector<1x8x256xf32>
    tpu.vector_store %arg8[%c0_14, %c0_15, %c0_16], %26 {strides = array<i32>} : memref<1x8x256xf32, #tpu.memory_space<vmem>>, vector<1x8x256xf32>,
    return
  }
  func.func @transform_0(%arg0: i32, %arg1: i32) -> i32 {
    %c0_i32 = arith.constant 0 : i32
    %c0_i32_0 = arith.constant 0 : i32
    return %c0_i32 : i32
  }
  func.func @transform_1(%arg0: i32, %arg1: i32) -> (i32, i32, i32) {
    %c0_i32 = arith.constant 0 : i32
    %c0_i32_0 = arith.constant 0 : i32
    return %arg0, %c0_i32, %arg1 : i32, i32, i32
  }
  func.func @transform_2(%arg0: i32, %arg1: i32) -> (i32, i32) {
    %c0_i32 = arith.constant 0 : i32
    %c0_i32_0 = arith.constant 0 : i32
    %c0_i32_1 = arith.constant 0 : i32
    return %c0_i32, %c0_i32_0 : i32, i32
  }
  func.func @transform_3(%arg0: i32, %arg1: i32) -> (i32, i32) {
    %c0_i32 = arith.constant 0 : i32
    %c0_i32_0 = arith.constant 0 : i32
    %c0_i32_1 = arith.constant 0 : i32
    return %c0_i32, %c0_i32_0 : i32, i32
  }
  func.func @transform_4(%arg0: i32, %arg1: i32) -> (i32, i32) {
    %c0_i32 = arith.constant 0 : i32
    %c0_i32_0 = arith.constant 0 : i32
    %c0_i32_1 = arith.constant 0 : i32
    return %c0_i32, %c0_i32_0 : i32, i32
  }
  func.func @transform_5(%arg0: i32, %arg1: i32) -> (i32, i32) {
    %c0_i32 = arith.constant 0 : i32
    %c0_i32_0 = arith.constant 0 : i32
    %c0_i32_1 = arith.constant 0 : i32
    return %c0_i32, %c0_i32_0 : i32, i32
  }
  func.func @transform_6(%arg0: i32, %arg1: i32) -> (i32, i32, i32) {
    %c0_i32 = arith.constant 0 : i32
    %c0_i32_0 = arith.constant 0 : i32
    return %arg0, %c0_i32, %arg1 : i32, i32, i32
  }
}

</mosaic_0001>

<bundles_post_ra>
// kernel: tpu_custom_call.1
= control target key start
LH: loop header
LB: loop body
LE: loop exit
PB: predicated region body
PF: predicated region fallthrough
CT: control target
= control target key end

     0   :  { %11 = vsyncpa [#allocation4], 0  ;;  %s1061_s0 = inlined_call_operand.vmem [shape: f32[2], index: 0, kind: input, shape index: {}]   ;;  %s1062_s1 = inlined_call_operand.vmem [shape: f32[2,4,256], index: 1, kind: input, shape index: {}]   ;;  %s1063_s2 = inlined_call_operand.vmem [shape: f32[32,4], index: 2, kind: input, shape index: {}]   ;;  %s1064_s3 = inlined_call_operand.vmem [shape: f32[32,1], index: 3, kind: input, shape index: {}]   ;;  %s1065_s4 = inlined_call_operand.vmem [shape: f32[8,32], index: 4, kind: input, shape index: {}]   ;;  %s1066_s5 = inlined_call_operand.vmem [shape: f32[8,1], index: 5, kind: input, shape index: {}]   ;;  %s1067_s6 = inlined_call_operand.hbm [shape: f32[2,8,256], index: 6, kind: output, shape index: {}]  }
   0x1   :  { %12 = vsyncpa [#allocation3], 0 }
   0x2   :  { %14 = vsyncpa [#allocation3 + $0x1], 0  ;;  %s898_s21 = smov 0   ;;  %s900_s22 = smov 0  }
   0x3   :  { %s902_s23 = smov 0   ;;  %s904_s24 = smov 0  }
   0x4   :  { %s906_s25 = smov 0   ;;  %s908_s26 = smov 0  }
   0x5 LB: > { %s656_s27 = sadd.s32 4294967295, %s857_s26   ;;  %s657_s28 = sadd.s32 4294967294, %s857_s26   ;;  %s857_s26 = sphi %s908_s26, %s20_s26   ;;  %s853_s25 = sphi %s906_s25, %s1076_s25   ;;  %s849_s24 = sphi %s904_s24, %s1075_s24   ;;  %s845_s23 = sphi %s902_s23, %s1074_s23   ;;  %s841_s22 = sphi %s900_s22, %s1073_s22   ;;  %s837_s21 = sphi %s898_s21, %s1072_s21  }
   0x6   : > { %s32_s29 = sadd.s32 1, %s853_s25  ;;  %s174_s30 = sadd.s32 1, %s845_s23 }
   0x7   : > { %p34_p0 = scmp.ge.s32.totalorder %s32_s29, 2  ;;  %p184_p1 = scmp.ne.s32.totalorder %s845_s23, %s841_s22 }
   0x8   : > { %p185_p2 = scmp.eq.s32.totalorder %s656_s27, 1  ;;  %p190_p3 = scmp.ne.s32.totalorder %s841_s22, %s837_s21 }
   0x9   : > { %s1078_s29 = smov (%p34_p0, %s32_s29), 0  ;;  %p191_p5 = scmp.eq.s32.totalorder %s657_s28, 1 }
   0xa   : > { %p938_p4 = por %p185_p2, %p184_p1  ;;  %s169_s8 = ssub.s32 %s853_s25, %s1078_s29 }
   0xb   : > { %p658_p6 = scmp.ge.s32.totalorder %s857_s26, 1  ;;  %p172_p7 = scmp.eq.s32.totalorder %s169_s8, 0 }
   0xc   : > { %p945_p8 = por %p191_p5, %p190_p3  ;;  %p198_p9 = scmp.lt.s32.totalorder %s857_s26, 3 }
   0xd   : > { %s951_s10 = scalar_select %p172_p7, %s845_s23, %s174_s30  }
   0xe   : > { %p953_p10 = pnand %p658_p6, %p198_p9  ;;  %p957_p11 = scmp.eq.s32.totalorder %s656_s27, 0 }
   0xf   : > { %s211_s15 = sshll.u32 %s1061_s0, 4  ;;  %s212_s15 = int_to_ptr.vmem [resolvable:$true] %s211_s15 }
  0x10   : > { %p695_p12 = pneg %p953_p10  ;;  %s760_s16 = scalar_lea.vmem %s212_s15, 16 }
  0x11   : > { %p761_p0 = scmp.ne.s32.totalorder %s212_s15, %s760_s16  ;;  %p768_p5 = scmp.lt.s32.totalorder %s212_s15, %s212_s15 }
  0x12   : > { %p696_p13 = pnand %p957_p11, %p695_p12  ;;  %p769_p6 = scmp.lt.s32.totalorder %s760_s16, %s760_s16 }
  0x14   : > { %p762_p1 = pneg %p696_p13  ;;  %p770_p7 = por %p769_p6, %p768_p5 }
  0x16   : > { %p763_p2 = pnand %p762_p1, %p761_p0 }
  0x18   : > { %p764_p3 = pneg %p763_p2 }
  0x1a   : > { %p771_p9 = pnand %p770_p7, %p764_p3 }
  0x1c   : > { %774 = shalt.err (!%p771_p9)
}
  0x1d   : > { %s859_s17 = smov [#allocation2]   ;;  %249 = sbr.rel (%p953_p10) target bundleno = 518 (0x206), region = 44 }
  0x1e   : > { %698 = dma.vmem_to_smem (!%p696_p13), %s212_s15, 16, %s859_s17, [#allocation4]  }
  0x24   : > { %828 = dma.done.wait (%p957_p11), [#allocation4], 16  }
  0x25   : > { %830 = vsyncadd (%p957_p11), [#allocation4], 4294967280 }
  0x26   : > { %255 = sfence }
  0x27   : > { %p285_p12 = scmp.lt.s32.totalorder %s849_s24, 1  ;;  %v860_v0 = vmov 0.0   ;;  %v300_v1 = vld [vmem:[%s1064_s3] sm:$0xff]  ;;  %v861_v2 = vmov 0   ;;  %v302_v3 = vld [vmem:[%s1064_s3 + $0x10] sm:$0xff]  ;;  %v301_v4 = vld [vmem:[%s1064_s3 + $0x8] sm:$0xff] }
  0x28   : > { %408 = vmatprep.mubr.f32.mxu0 %v860_v0  ;;  %534 = vmatprep.mubr.f32.mxu1 %v860_v0  ;;  %v303_v5 = vld [vmem:[%s1064_s3 + $0x18] sm:$0xff]  ;;  %vm339_vm0 = vcmask 1043456   ;;  %v296_v8 = vld [vmem:[%s1063_s2] sm:$0xff]  ;;  %vm326_vm1 = vcmask 31744   ;;  %v297_v10 = vld [vmem:[%s1063_s2 + $0x8] sm:$0xff]  ;;  %s433_s13 = sld [smem:[#allocation2]] }
  0x29   : > { %s286_s20 = scalar_select %p285_p12, %s849_s24, 1  ;;  %757 = vset.pattern.permute.xlu0 %v861_v2  ;;  %758 = vset.pattern.permute.xlu1 %v861_v2  ;;  %v460_v9 = vld [vmem:[%s1066_s5] sm:$0xff]  ;;  %v298_v11 = vld [vmem:[%s1063_s2 + $0x10] sm:$0xff]  ;;  %v299_v12 = vld [vmem:[%s1063_s2 + $0x18] sm:$0xff]  ;;  %vm466_vm10 = vcmask 261120  }
  0x2a   : > { %306 = vperm.xlu0 %757, %v300_v1   ;;  %316 = vperm.xlu1 %758, %v302_v3   ;;  %v459_v54 = vld [vmem:[%s1065_s4] sm:$0xff]  ;;  %s281_s17 = sand.u32 1, %s841_s22   ;;  %s680_s19 = sshll.u32 %s849_s24, 8 }
  0x2b   : > { %s679_s30 = sshll.u32 %s286_s20, 3  ;;  %s663_s18 = sshll.u32 %s281_s17, 4 }
  0x2c   : > { %s292_s16 = scalar_lea.vmem %s1062_s1, %s679_s30  ;;  %s283_s20 = scalar_lea.vmem [#allocation5], %s663_s18 }
  0x2d   : > { %v295_v6 = vld [vmem:[%s292_s16] sm:$0xff]  ;;  %s673_s16 = sld [smem:[#allocation2 + $0x1]]  ;;  %s568_s27 = sshll.u32 %s283_s20, 4  ;;  %s1016_s27 = int_to_ptr.vmem [resolvable:$true] %s568_s27 }
  0x2e   : > { %v325_v7 = vcombine.high %v295_v6, %v295_v6  ;;  %311 = vperm.xlu0 %757, %v301_v4   ;;  %321 = vperm.xlu1 %758, %v303_v5   ;;  %v442_v17 = vstv %s433_s13  ;;  %s1014_s8 = scalar_lea.hbm %s1067_s6, %s680_s19  ;;  %s552_s24 = scalar_lea.sflag [#allocation3], %s281_s17 }
  0x2f   : > { %s775_s11 = scalar_lea.vmem %s1016_s27, 256  ;;  %s862_s12 = smov [#allocation5]  }
  0x30   : > { %666 = vmatprep.subr.msk.mxu0 %vm339_vm0, %v325_v7  ;;  %p776_p10 = scmp.ne.s32.totalorder %s1016_s27, %s775_s11  ;;  %s779_s13 = sshll.u32 %s862_s12, 4  ;;  %s780_s13 = int_to_ptr.vmem [resolvable:$false] %s779_s13 }
  0x31   : > { %667 = vmatpush1.msk.msra.mxu0 %vm339_vm0, %v295_v6  ;;  %s781_s14 = scalar_lea.vmem %s780_s13, 512  ;;  %p782_p0 = scmp.lt.s32.totalorder %s1016_s27, %s780_s13 }
  0x32   : > { %668 = vmatmul.mubr.msk.f32.vlgmr.msra.gmra.mrb[0].mxu0 %vm326_vm1, %v296_v8  ;;  %463 = vperm.xlu0 %757, %v460_v9   ;;  %p777_p11 = pnand %p776_p10, %p938_p4  ;;  %p783_p1 = scmp.lt.s32.totalorder %s781_s14, %s775_s11 }
  0x33   : > { %414 = vmatprep.mubr.f32.mxu0 %v860_v0  ;;  %v544_v57 = vstv %s673_s16 }
  0x34   : > { %p778_p13 = pneg %p777_p11  ;;  %p784_p2 = por %p783_p1, %p782_p0 }
  0x36   : > { %669 = vmatmul.mubr.msk.f32.gmra.mrb[2].mxu0 %vm326_vm1, %v297_v10  ;;  %p785_p3 = pnand %p784_p2, %p778_p13 }
  0x37   : > { %420 = vmatprep.mubr.f32.mxu0 %v860_v0 }
  0x3a   : > { %670 = vmatmul.mubr.msk.f32.gmra.mrb[4].mxu0 %vm326_vm1, %v298_v11 }
  0x3b   : > { %426 = vmatprep.mubr.f32.mxu0 %v860_v0 }
  0x3e   : > { %671 = vmatmul.mubr.msk.f32.gmra.mrb[6].mxu0 %vm326_vm1, %v299_v12 }
  0xa9   : > { %v307_v13 = vpop.permute.xlu0 %306  ;;  %v317_v25 = vpop.permute.xlu1 %316 }
  0xad   : > { %v312_v19 = vpop.permute.xlu0 %311  ;;  %v322_v39 = vpop.permute.xlu1 %321 }
  0xb1   : > { %v464_v55 = vpop.permute.xlu0 %463 }
 0x105   : > { %v410_v14 = vpop.f32.mrb[0].mxu0 }
 0x106   : > { %v411_v15 = vadd.f32 %v410_v14, %v307_v13  ;;  %v412_v16 = vpop.f32.mrb[1].mxu0 }
 0x107   : > { %v413_v18 = vadd.f32 %v412_v16, %v307_v13 }
 0x108   : > { %v443_v21 = vmul.f32 %v442_v17, %v411_v15  ;;  %vm434_vm2 = vcmp.gt.f32.partialorder %v411_v15, 0.0 }
 0x109   : > { %v416_v20 = vpop.f32.mrb[2].mxu0  ;;  %v444_v24 = vmul.f32 %v442_v17, %v413_v18  ;;  %vm435_vm3 = vcmp.gt.f32.partialorder %v413_v18, 0.0 }
 0x10a   : > { %v417_v22 = vadd.f32 %v416_v20, %v312_v19  ;;  %v418_v23 = vpop.f32.mrb[3].mxu0  ;;  %v451_v32 = vsel %vm434_vm2, %v411_v15, %v443_v21 }
 0x10b   : > { %v419_v26 = vadd.f32 %v418_v23, %v312_v19  ;;  %v452_v35 = vsel %vm435_vm3, %v413_v18, %v444_v24 }
 0x10c   : > { %v445_v27 = vmul.f32 %v442_v17, %v417_v22  ;;  %vm436_vm4 = vcmp.gt.f32.partialorder %v417_v22, 0.0 }
 0x10d   : > { %v446_v28 = vmul.f32 %v442_v17, %v419_v26  ;;  %v422_v29 = vpop.f32.mrb[4].mxu0  ;;  %vm437_vm5 = vcmp.gt.f32.partialorder %v419_v26, 0.0 }
 0x10e   : > { %v423_v30 = vadd.f32 %v422_v29, %v317_v25  ;;  %v424_v31 = vpop.f32.mrb[5].mxu0  ;;  %v453_v33 = vsel %vm436_vm4, %v417_v22, %v445_v27 }
 0x10f   : > { %v425_v34 = vadd.f32 %v424_v31, %v317_v25  ;;  %v454_v36 = vsel %vm437_vm5, %v419_v26, %v446_v28  ;;  %v683_v37 = vpack.c.bf16 %v453_v33, %v451_v32 }
 0x110   : > { %v681_v38 = vpack.c.bf16 %v454_v36, %v452_v35  ;;  %v447_v41 = vmul.f32 %v442_v17, %v423_v30  ;;  %vm438_vm6 = vcmp.gt.f32.partialorder %v423_v30, 0.0 }
 0x111   : > { %v428_v40 = vpop.f32.mrb[6].mxu0  ;;  %v448_v44 = vmul.f32 %v442_v17, %v425_v34  ;;  %vm439_vm7 = vcmp.gt.f32.partialorder %v425_v34, 0.0 }
 0x112   : > { %v429_v42 = vadd.f32 %v428_v40, %v322_v39  ;;  %v430_v43 = vpop.f32.mrb[7].mxu0  ;;  %682 = vmatprep.subr.bf16.mxu1 %v681_v38  ;;  %v455_v48 = vsel %vm438_vm6, %v423_v30, %v447_v41 }
 0x113   : > { %v431_v45 = vadd.f32 %v430_v43, %v322_v39  ;;  %684 = vmatpush1.bf16.msra.mxu1 %v683_v37  ;;  %v456_v50 = vsel %vm439_vm7, %v425_v34, %v448_v44 }
 0x114   : > { %vm440_vm8 = vcmp.gt.f32.partialorder %v429_v42, 0.0  ;;  %v449_v46 = vmul.f32 %v442_v17, %v429_v42 }
 0x115   : > { %vm441_vm9 = vcmp.gt.f32.partialorder %v431_v45, 0.0  ;;  %v450_v47 = vmul.f32 %v442_v17, %v431_v45 }
 0x116   : > { %v457_v49 = vsel %vm440_vm8, %v429_v42, %v449_v46 }
 0x117   : > { %v458_v51 = vsel %vm441_vm9, %v431_v45, %v450_v47  ;;  %v687_v52 = vpack.c.bf16 %v457_v49, %v455_v48 }
 0x118   : > { %v685_v53 = vpack.c.bf16 %v458_v51, %v456_v50 }
 0x11a   : > { %686 = vmatprep.subr.bf16.mxu1 %v685_v53 }
 0x11b   : > { %688 = vmatpush1.bf16.msra.mxu1 %v687_v52 }
 0x11e   : > { %672 = vmatmul.mubr.msk.f32.vlgmr.msra.gmra.mrb[0].mxu1 %vm466_vm10, %v459_v54 }
 0x1f1   : > { %v536_v56 = vpop.f32.mrb[0].mxu1 }
 0x1f2   : > { %v537_v58 = vadd.f32 %v536_v56, %v464_v55  ;;  %v538_v59 = vpop.f32.mrb[1].mxu1 }
 0x1f3   : > { %v539_v60 = vadd.f32 %v538_v59, %v464_v55 }
 0x1f4   : > { %vm542_vm11 = vcmp.gt.f32.partialorder %v537_v58, 0.0  ;;  %v545_v61 = vmul.f32 %v544_v57, %v537_v58 }
 0x1f5   : > { %vm543_vm12 = vcmp.gt.f32.partialorder %v539_v60, 0.0  ;;  %v546_v62 = vmul.f32 %v544_v57, %v539_v60 }
 0x1f6   : > { %v547_v63 = vsel %vm542_vm11, %v537_v58, %v545_v61 }
 0x1f7   : > { %v548_v0 = vsel %vm543_vm12, %v539_v60, %v546_v62  ;;  %549 = vst [vmem:[%s283_s20] sm:$0xff] %v547_v63 }
 0x1f8   : > { %550 = vst [vmem:[%s283_s20 + $0x8] sm:$0xff] %v548_v0 }
 0x1f9   : > { %788 = shalt.err (!%p785_p3)
}
 0x1fa   : > { %s789_s15 = scalar_lea.hbm %s1014_s8, 256  ;;  %s793_s18 = scalar_lea.hbm %s1067_s6, 512 }
 0x1fb   : > { %p790_p5 = scmp.ne.s32.totalorder %s1014_s8, %s789_s15  ;;  %p794_p9 = scmp.lt.u32.totalorder %s1014_s8, %s1067_s6 }
 0x1fc   : > { %p795_p12 = scmp.lt.u32.totalorder %s793_s18, %s789_s15  ;;  %p797_p11 = scmp.lt.u32.totalorder %s789_s15, %s1014_s8 }
 0x1fd   : > { %p791_p6 = pnand %p790_p5, %p938_p4 }
 0x1fe   : > { %p796_p10 = por %p795_p12, %p794_p9 }
 0x1ff   : > { %p792_p7 = pneg %p791_p6 }
 0x200   : > { %p798_p13 = por %p797_p11, %p796_p10 }
 0x202   : > { %p799_p0 = pnand %p798_p13, %p792_p7 }
 0x204   : > { %802 = shalt.err (!%p799_p0)
}
 0x205   : > { %693 = dma.vmem_to_hbm [thread:$0]  (%p938_p4), %s1016_s27, 256, %s1014_s8, %s552_s24  }
 0x206 PF: > { %p705_p1 = scmp.ge.s32.totalorder %s857_s26, 2  ;;  %s580_s28 = sand.u32 1, %s837_s21  }
 0x207   : > { %s581_s30 = scalar_lea.sflag [#allocation3], %s580_s28 }
 0x208   : > { %p700_p2 = pnand %p705_p1, %p945_p8 }
 0x20a   : > { %832 = dma.done.wait (!%p700_p2), %s581_s30, 256  }
 0x20b   : > { %834 = vsyncadd (!%p700_p2), %s581_s30, 4294967040  ;;  %s20_s26 = sadd.s32 1, %s857_s26   ;;  %s1072_s21 = smov %s841_s22 }
 0x20c   : > { %p17_p3 = scmp.ge.s32.totalorder %s20_s26, 4   ;;  %s1073_s22 = smov %s845_s23 }
 0x20d   : > { %s1074_s23 = smov %s951_s10  ;;  %s1075_s24 = smov %s853_s25 }
 0x20e   : > { %s1076_s25 = smov %s1078_s29  ;;  %19 = sbr.rel (!%p17_p3) target bundleno = 5 (0x5), region = 84 }
 0x215   :  { %586 = vsyncpa [#allocation3], 1 }
 0x216   :  { %588 = vsyncpa [#allocation3 + $0x1], 1 }
 0x217   :  { %589 = vsyncpa [#allocation4], 1 }
 0x218   :  { %591 = vsyncpa [#allocation4 + $0x1], 1 }

</bundles_post_ra>
